<compile_context>
chip_gen: v5e
topology: v5e:2x2
jax: 0.10.0
libtpu: 0.0.40
codegen_flags: <defaults>
</compile_context>

<pallas_src>
import math

import jax
import jax.numpy as jnp
from jax.experimental import pallas as pl
from jax.experimental.pallas import tpu as pltpu


def _round_up(x: int, m: int) -> int:
    return ((x + m - 1) // m) * m


def _cdiv(a: int, b: int) -> int:
    return (a + b - 1) // b


def patch_embed_kernel(x_ref, w_ref, b_ref, o_ref):
    """One (TM, K) x (K, H) MXU pass of the patch-embedding GEMM.

    x_ref: (TM, k_pad) patches      w_ref: (k_pad, h_pad) weight (VMEM-resident)
    b_ref: (1, h_pad) f32 bias      o_ref: (TM, h_pad) output
    """
    acc = jnp.dot(x_ref[...], w_ref[...], preferred_element_type=jnp.float32)
    o_ref[...] = (acc + b_ref[...]).astype(o_ref.dtype)


def patch_embedding(x, weight, bias, patch_size, *, compute_dtype=jnp.bfloat16,
                    out_dtype=None, tm_max=1024):
    """x: [N, C, H, W]; weight: [hidden, C, p, p]; bias: [hidden].

    Returns [N, (H//p)*(W//p), hidden], matching the PyTorch module's forward.
    """
    n, c, h, w = x.shape
    p = patch_size
    assert h % p == 0 and w % p == 0, "Input shape indivisible by patch size!"
    hidden = weight.shape[0]
    n_h, n_w = h // p, w // p
    seq = n_h * n_w
    k = c * p * p
    m = n * seq

    if out_dtype is None:
        out_dtype = compute_dtype if compute_dtype is not None else x.dtype

    # Cast BEFORE the patchify transpose so any materialized [M, K] patch tensor
    # is already in the (narrower) compute dtype.
    if compute_dtype is not None and x.dtype != compute_dtype:
        x = x.astype(compute_dtype)

    # Patchify: [N,C,H,W] -> [M, K], rows flattened in (c, ph, pw) order to
    # match the conv weight's (C, kh, kw) flattening.
    # TODO(synk): if xprof shows allow_input_fusion does not fuse this 6-D
    # transpose into the input DMA, replace it with an in-kernel strided DMA
    # gather from the NCHW HBM ref (memory_space=pl.ANY).
    patches = x.reshape(n, c, n_h, p, n_w, p)
    patches = patches.transpose(0, 2, 4, 1, 3, 5).reshape(m, k)

    w_mat = weight.reshape(hidden, k).T                     # [K, hidden]
    if compute_dtype is not None and w_mat.dtype != compute_dtype:
        w_mat = w_mat.astype(compute_dtype)
    b_row = bias.reshape(1, hidden).astype(jnp.float32)     # bias add stays f32

    # Pad lane dims (K, hidden) to multiples of 128: full MXU tiles and
    # lane-dense (unmasked) output stores. Zero padding is exact.
    k_pad = _round_up(k, 128)
    h_pad = _round_up(hidden, 128)

    # M tiling: big tiles, cdiv grid (pad M up to a tile multiple). If a single
    # tile would cover everything, split it so v7x's two TensorCores both work.
    tm = min(tm_max, _round_up(m, 16))
    if _cdiv(m, tm) == 1 and tm >= 32:
        tm = _round_up(_cdiv(tm, 2), 16)
    m_tiles = _cdiv(m, tm)
    m_pad = m_tiles * tm

    if (m_pad, k_pad) != (m, k):
        patches = jnp.pad(patches, ((0, m_pad - m), (0, k_pad - k)))
    if (k_pad, h_pad) != (k, hidden):
        w_mat = jnp.pad(w_mat, ((0, k_pad - k), (0, h_pad - hidden)))
    if h_pad != hidden:
        b_row = jnp.pad(b_row, ((0, 0), (0, h_pad - hidden)))

    in_bytes = jnp.dtype(patches.dtype).itemsize
    w_bytes = jnp.dtype(w_mat.dtype).itemsize
    out_bytes = jnp.dtype(out_dtype).itemsize

    # VMEM footprint: double-buffered patch + output tiles, resident weight,
    # bias. Budgeted against v7x's 64 MiB physical VMEM.
    vmem_est = (2 * tm * k_pad * in_bytes
                + k_pad * h_pad * w_bytes
                + 2 * h_pad * 4
                + 2 * tm * h_pad * out_bytes)
    vmem_limit = min(64 * 1024 * 1024,
                     max(32 * 1024 * 1024, (vmem_est * 3) // 2))

    cost = pl.CostEstimate(
        flops=2 * m_pad * k_pad * h_pad,
        transcendentals=0,
        bytes_accessed=(m_pad * k_pad * in_bytes          # patches, read once
                        + k_pad * h_pad * w_bytes         # weight, read once
                        + h_pad * 4                       # bias
                        + m_pad * h_pad * out_bytes),     # output, written once
    )

    out = pl.pallas_call(
        patch_embed_kernel,
        out_shape=jax.ShapeDtypeStruct((m_pad, h_pad), out_dtype),
        grid_spec=pltpu.PrefetchScalarGridSpec(
            num_scalar_prefetch=0,
            grid=(m_tiles,),
            in_specs=[
                pl.BlockSpec((tm, k_pad), lambda i: (i, 0)),
                # Constant block index => weight is fetched once and stays
                # resident in VMEM for the whole grid.
                pl.BlockSpec((k_pad, h_pad), lambda i: (0, 0)),
                pl.BlockSpec((1, h_pad), lambda i: (0, 0)),
            ],
            out_specs=pl.BlockSpec((tm, h_pad), lambda i: (i, 0)),
        ),
        compiler_params=pltpu.CompilerParams(
            dimension_semantics=("parallel",),
            vmem_limit_bytes=vmem_limit,
            # Allow XLA to fuse the patchify reshape/transpose (input 0) into
            # the pallas_call input DMA instead of materializing it in HBM.
            allow_input_fusion=[True, False, False],
        ),
        cost_estimate=cost,
    )(patches, w_mat, b_row)

    return out[:m, :hidden].reshape(n, seq, hidden)


if __name__ == "__main__":
    image_size = 16
    patch_size = 4
    hidden_dim = 32
    in_channels = 3
    batch = 2

    key = jax.random.PRNGKey(0)
    kx, kw, kb = jax.random.split(key, 3)

    x = jax.random.normal(
        kx, (batch, in_channels, image_size, image_size), dtype=jnp.float32)

    # Weight init mirroring PyTorch: trunc_normal(std=sqrt(1/fan_in)).
    fan_in = in_channels * patch_size * patch_size
    std = math.sqrt(1.0 / fan_in)
    weight = std * jax.random.truncated_normal(
        kw, -2.0, 2.0,
        (hidden_dim, in_channels, patch_size, patch_size), dtype=jnp.float32)
    # Non-zero bias so the epilogue path is actually exercised.
    bias = 0.1 * jax.random.normal(kb, (hidden_dim,), dtype=jnp.float32)

    # Reference: plain-JAX conv-as-matmul (f32).
    n_h = image_size // patch_size
    seq = n_h * n_h
    ref_patches = x.reshape(batch, in_channels, n_h, patch_size, n_h, patch_size)
    ref_patches = ref_patches.transpose(0, 2, 4, 1, 3, 5).reshape(batch, seq, fan_in)
    ref = jnp.einsum("nsk,hk->nsh", ref_patches,
                     weight.reshape(hidden_dim, fan_in)) + bias

    # Default path: bf16 operands + bf16 output (f32 accumulate / bias add).
    out = jax.block_until_ready(patch_embedding(x, weight, bias, patch_size))
    assert out.shape == (batch, seq, hidden_dim)
    assert out.dtype == jnp.bfloat16
    assert jnp.allclose(out.astype(jnp.float32), ref, atol=5e-2, rtol=5e-2)

    # Full-precision path: f32 operands and f32 output, tight tolerance.
    out_f32 = jax.block_until_ready(
        patch_embedding(x, weight, bias, patch_size,
                        compute_dtype=None, out_dtype=jnp.float32))
    assert out_f32.dtype == jnp.float32
    assert jnp.allclose(out_f32, ref, atol=1e-5, rtol=1e-5)

    print("KERNEL_OK")
</pallas_src>

<mosaic_0001>
module attributes {stable_mosaic.version = 11 : i64} {
  func.func @patch_embed_kernel(%arg0: i32, %arg1: memref<16x128xbf16, #tpu.memory_space<vmem>>, %arg2: memref<128x128xbf16, #tpu.memory_space<vmem>>, %arg3: memref<1x128xf32, #tpu.memory_space<vmem>>, %arg4: memref<16x128xbf16, #tpu.memory_space<vmem>>) attributes {dimension_semantics = [#tpu.dimension_semantics<parallel>], iteration_bounds = array<i64: 2>, scalar_prefetch = 0 : i64, scratch_operands = 0 : i64, tpu.core_type = #tpu.core_type<tc>, window_params = [{transform_indices = @transform_0, window_bounds = array<i64: 16, 128>}, {pipeline_mode = #tpu.pipeline_mode<synchronous>, transform_indices = @transform_1, window_bounds = array<i64: 128, 128>}, {pipeline_mode = #tpu.pipeline_mode<synchronous>, transform_indices = @transform_2, window_bounds = array<i64: 1, 128>}, {transform_indices = @transform_3, window_bounds = array<i64: 16, 128>}]} {
    %c0 = arith.constant 0 : index
    %c0_0 = arith.constant 0 : index
    %0 = vector.load %arg1[%c0, %c0_0] : memref<16x128xbf16, #tpu.memory_space<vmem>>, vector<16x128xbf16>
    %c0_1 = arith.constant 0 : index
    %c0_2 = arith.constant 0 : index
    %1 = vector.load %arg2[%c0_1, %c0_2] : memref<128x128xbf16, #tpu.memory_space<vmem>>, vector<128x128xbf16>
    %cst = arith.constant dense<0.000000e+00> : vector<16x128xf32>
    %2 = tpu.matmul %0, %1, %cst {dimension_numbers = #tpu.dot_dimension_numbers<[1], [0], [0], [1], [0, 0, 1, 1], [], []>} : vector<16x128xbf16>, vector<128x128xbf16>, vector<16x128xf32> -> vector<16x128xf32>
    %c0_3 = arith.constant 0 : index
    %c0_4 = arith.constant 0 : index
    %3 = vector.load %arg3[%c0_3, %c0_4] : memref<1x128xf32, #tpu.memory_space<vmem>>, vector<1x128xf32>
    %4 = vector.broadcast %3 : vector<1x128xf32> to vector<16x128xf32>
    %5 = arith.addf %2, %4 : vector<16x128xf32>
    %6 = arith.truncf %5 : vector<16x128xf32> to vector<16x128xbf16>
    %c0_5 = arith.constant 0 : index
    %c0_6 = arith.constant 0 : index
    %7 = vector.load %arg4[%c0_5, %c0_6] : memref<16x128xbf16, #tpu.memory_space<vmem>>, vector<16x128xbf16>
    tpu.vector_store %arg4[%c0_5, %c0_6], %6 {strides = array<i32>} : memref<16x128xbf16, #tpu.memory_space<vmem>>, vector<16x128xbf16>,
    return
  }
  func.func @transform_0(%arg0: i32) -> (i32, i32) {
    %c0_i32 = arith.constant 0 : i32
    %c0_i32_0 = arith.constant 0 : i32
    return %arg0, %c0_i32 : i32, i32
  }
  func.func @transform_1(%arg0: i32) -> (i32, i32) {
    %c0_i32 = arith.constant 0 : i32
    %c0_i32_0 = arith.constant 0 : i32
    %c0_i32_1 = arith.constant 0 : i32
    return %c0_i32, %c0_i32_0 : i32, i32
  }
  func.func @transform_2(%arg0: i32) -> (i32, i32) {
    %c0_i32 = arith.constant 0 : i32
    %c0_i32_0 = arith.constant 0 : i32
    %c0_i32_1 = arith.constant 0 : i32
    return %c0_i32, %c0_i32_0 : i32, i32
  }
  func.func @transform_3(%arg0: i32) -> (i32, i32) {
    %c0_i32 = arith.constant 0 : i32
    %c0_i32_0 = arith.constant 0 : i32
    return %arg0, %c0_i32 : i32, i32
  }
}

</mosaic_0001>

<bundles_post_ra>
// kernel: tpu_custom_call.1
= control target key start
LH: loop header
LB: loop body
LE: loop exit
PB: predicated region body
PF: predicated region fallthrough
CT: control target
= control target key end

     0   :  { %8 = vsyncpa [#allocation3], 0  ;;  %s837_s0 = inlined_call_operand.hbm [shape: bf16[32,128], index: 0, kind: input, shape index: {}]   ;;  %s838_s1 = inlined_call_operand.hbm [shape: bf16[128,128], index: 1, kind: input, shape index: {}]   ;;  %s839_s2 = inlined_call_operand.vmem [shape: f32[1,128], index: 2, kind: input, shape index: {}]   ;;  %s840_s3 = inlined_call_operand.hbm [shape: bf16[32,128], index: 3, kind: output, shape index: {}]  }
   0x1   :  { %10 = vsyncpa [#allocation3 + $0x1], 0 }
   0x2   :  { %11 = vsyncpa [#allocation6], 0 }
   0x3   :  { %12 = vsyncpa [#allocation4], 0 }
   0x4   :  { %14 = vsyncpa [#allocation4 + $0x1], 0  ;;  %s690_s12 = smov 0   ;;  %s692_s13 = smov 0  }
   0x5   :  { %s694_s14 = smov 0   ;;  %s696_s15 = smov 0  }
   0x6 LB: > { %s711_s16 = sadd.s32 4294967295, %s663_s15   ;;  %s403_s17 = sadd.s32 4294967294, %s663_s15   ;;  %s663_s15 = sphi %s696_s15, %s850_s15   ;;  %s659_s14 = sphi %s694_s14, %s849_s14   ;;  %s655_s13 = sphi %s692_s13, %s848_s13   ;;  %s651_s12 = sphi %s690_s12, %s847_s12  }
   0x7   : > { %p40_p0 = scmp.ne.s32.totalorder %s655_s13, %s651_s12  ;;  %p41_p1 = scmp.eq.s32.totalorder %s711_s16, 0 }
   0x8   : > { %p106_p2 = scmp.eq.s32.totalorder %s711_s16, 1  ;;  %p112_p3 = scmp.eq.s32.totalorder %s403_s17, 1 }
   0x9   : > { %p720_p4 = por %p41_p1, %p40_p0  ;;  %p404_p5 = scmp.ge.s32.totalorder %s663_s15, 1 }
   0xa   : > { %p725_p6 = por %p112_p3, %p40_p0  ;;  %p119_p7 = scmp.lt.s32.totalorder %s663_s15, 3 }
   0xb   : > { %s130_s22 = sshll.u32 %s838_s1, 4  ;;  %s665_s24 = smov [#allocation5]   ;;  %s131_s22 = int_to_ptr.hbm [resolvable:$true] %s130_s22 }
   0xc   : > { %p733_p8 = pnand %p404_p5, %p119_p7  ;;  %s132_s25 = sshll.u32 %s665_s24, 4  ;;  %s133_s25 = int_to_ptr.vmem [resolvable:$true] %s132_s25 }
   0xd   : > { %s743_s26 = sadd.s32 1, %s663_s15   ;;  %s666_s27 = smov 64  }
   0xe   : > { %p479_p9 = pneg %p733_p8  ;;  %s667_s28 = smov 4  }
   0xf   : > { %s24_s29 = ssub.s32 %s663_s15, %s743_s26  ;;  %s27_s30 = sadd.s32 1, %s659_s14 }
  0x10   : > { %p480_p10 = pnand %p479_p9, %p41_p1  ;;  %p25_p12 = scmp.eq.s32.totalorder %s24_s29, 0 }
  0x11   : > { %p34_p13 = scmp.ne.s32.totalorder %s659_s14, %s655_s13  ;;  %p35_p0 = scmp.eq.s32.totalorder %s663_s15, 0 }
  0x12   : > { %482 = dma.hbm_to_vmem [thread:$0]  (!%p480_p10), %s131_s22, 1024, %s133_s25, [#allocation6], %s666_s27, %s666_s27, %s667_s28  }
  0x13   : > { %s755_s4 = scalar_select %p25_p12, %s659_s14, %s27_s30  }
  0x14   : > { %p759_p3 = por %p106_p2, %p34_p13  ;;  %p492_p5 = scmp.lt.s32.totalorder %s663_s15, 2 }
  0x15   : > { %s149_s6 = sand.u32 1, %s659_s14   ;;  %s455_s7 = sshll.u32 %s663_s15, 3 }
  0x16   : > { %p36_p7 = por %p35_p0, %p34_p13  ;;  %s407_s8 = sshll.u32 %s149_s6, 3 }
  0x17   : > { %s158_s11 = scalar_lea.hbm %s837_s0, %s455_s7  ;;  %s153_s20 = scalar_lea.vmem [#allocation2], %s407_s8 }
  0x18   : > { %s159_s17 = sshll.u32 %s158_s11, 4  ;;  %s161_s21 = sshll.u32 %s153_s20, 4  ;;  %s160_s17 = int_to_ptr.hbm [resolvable:$true] %s159_s17  ;;  %s162_s21 = int_to_ptr.vmem [resolvable:$true] %s161_s21 }
  0x19   : > { %p769_p9 = pnand %p492_p5, %p36_p7  ;;  %s150_s24 = scalar_lea.sflag [#allocation3], %s149_s6 }
  0x1a   : > { %s563_s25 = sshra.s32 %s160_s17, 4  ;;  %s570_s8 = scalar_lea.hbm %s837_s0, 16  ;;  %s564_s25 = int_to_ptr.hbm [resolvable:$true] %s563_s25 }
  0x1b   : > { %s565_s29 = scalar_lea.hbm %s564_s25, 8  ;;  %p567_p10 = pneg %p769_p9 }
  0x1c   : > { %p566_p2 = scmp.ne.s32.totalorder %s564_s25, %s565_s29  ;;  %p571_p0 = scmp.lt.s32.totalorder %s564_s25, %s837_s0 }
  0x1d   : > { %p572_p5 = scmp.lt.s32.totalorder %s570_s8, %s565_s29 }
  0x1e   : > { %p568_p12 = pnand %p567_p10, %p566_p2 }
  0x1f   : > { %p573_p7 = por %p572_p5, %p571_p0 }
  0x20   : > { %p569_p13 = pneg %p568_p12 }
  0x22   : > { %p574_p11 = pnand %p573_p7, %p569_p13 }
  0x24   : > { %577 = shalt.err (!%p574_p11)
}
  0x25   : > { %486 = dma.hbm_to_vmem [thread:$0]  (!%p769_p9), %s160_s17, 128, %s162_s21, %s150_s24, %s666_s27, %s666_s27, %s667_s28  }
  0x26   : > { %173 = sbr.rel (%p733_p8) target bundleno = 220 (0xdc), region = 32  ;;  %s789_s6 = sand.u32 (!%p733_p8), 1, %s655_s13  }
  0x27   : > { %s411_s11 = sshll.u32 (!%p733_p8), %s789_s6, 3  ;;  %s176_s20 = scalar_lea.sflag (!%p733_p8), [#allocation3], %s789_s6 }
  0x28   : > { %s179_s25 = scalar_lea.vmem (!%p733_p8), [#allocation2], %s411_s11 }
  0x2b   : > { %638 = dma.done.wait (%p720_p4), %s176_s20, 128  }
  0x2c   : > { %640 = vsyncadd (%p720_p4), %s176_s20, 4294967168 }
  0x2d   : > { %642 = dma.done.wait (%p41_p1), [#allocation6], 1024  }
  0x2e   : > { %644 = vsyncadd (%p41_p1), [#allocation6], 4294966272  ;;  %v464_v0 = vld [vmem:[#allocation5 + $0x38] sm:$0xff]  ;;  %v463_v1 = vld [vmem:[#allocation5 + $0x30] sm:$0xff]  ;;  %s465_s18 = sshll.u32 %s711_s16, 3  ;;  %s207_s22 = scalar_lea.vmem [#allocation7], %s411_s11 }
  0x2f   : > { %286 = vmatpush.bf16.msra.mxu0 %v464_v0  ;;  %v462_v2 = vld [vmem:[#allocation5 + $0x28] sm:$0xff]  ;;  %v461_v3 = vld [vmem:[#allocation5 + $0x20] sm:$0xff]  ;;  %v460_v4 = vld [vmem:[#allocation5 + $0x18] sm:$0xff]  ;;  %s316_s28 = scalar_lea.hbm %s840_s3, %s465_s18  ;;  %s317_s24 = sshll.u32 %s207_s22, 4  ;;  %s318_s24 = int_to_ptr.vmem [resolvable:$true] %s317_s24 }
  0x30   : > { %v459_v5 = vld [vmem:[#allocation5 + $0x10] sm:$0xff]  ;;  %v458_v6 = vld [vmem:[#allocation5 + $0x8] sm:$0xff]  ;;  %v457_v7 = vld [vmem:[#allocation5] sm:$0xff]  ;;  %s319_s29 = sshll.u32 %s316_s28, 4  ;;  %s305_s16 = scalar_lea.sflag [#allocation4], %s789_s6  ;;  %s320_s29 = int_to_ptr.hbm [resolvable:$true] %s319_s29 }
  0x31   : > { %v456_v8 = vld [vmem:[%s179_s25] sm:$0xff]  ;;  %s607_s30 = sshra.s32 %s320_s29, 4  ;;  %s613_s10 = scalar_lea.hbm %s840_s3, 16  ;;  %s608_s30 = int_to_ptr.hbm [resolvable:$true] %s607_s30 }
  0x32   : > { %v532_v10 = vld [vmem:[%s839_s2] ss:$0 sm:$0xff]  ;;  %s609_s7 = scalar_lea.hbm %s608_s30, 8  ;;  %p614_p11 = scmp.lt.s32.totalorder %s608_s30, %s840_s3 }
  0x33   : > { %287 = vmatpush.bf16.msra.mxu0 %v463_v1  ;;  %p610_p1 = scmp.ne.s32.totalorder %s608_s30, %s609_s7  ;;  %p615_p9 = scmp.lt.s32.totalorder %s613_s10, %s609_s7 }
  0x35   : > { %p611_p4 = pnand %p610_p1, %p759_p3  ;;  %p616_p2 = por %p615_p9, %p614_p11 }
  0x37   : > { %288 = vmatpush.bf16.msra.mxu0 %v462_v2  ;;  %p612_p8 = pneg %p611_p4 }
  0x39   : > { %p617_p10 = pnand %p616_p2, %p612_p8 }
  0x3b   : > { %289 = vmatpush.bf16.msra.mxu0 %v461_v3 }
  0x3f   : > { %290 = vmatpush.bf16.msra.mxu0 %v460_v4 }
  0x43   : > { %291 = vmatpush.bf16.msra.mxu0 %v459_v5 }
  0x47   : > { %292 = vmatpush.bf16.msra.mxu0 %v458_v6 }
  0x4b   : > { %293 = vmatpush.bf16.msra.mxu0 %v457_v7 }
  0x4e   : > { %294 = vmatmul.bf16.vlgmr.msra.gmra.mxu0 %v456_v8 }
  0xcb   : > { %v295_v9 = vpop.f32.mrf.mxu0 }
  0xcc   : > { %v296_v12 = vadd.f32 %v532_v10, %v295_v9 }
  0xd3   : > { %v297_v11 = vpop.f32.mrf.mxu0 }
  0xd4   : > { %v298_v13 = vadd.f32 %v532_v10, %v297_v11 }
  0xd6   : > { %v469_v14 = vpack.c.bf16 %v298_v13, %v296_v12 }
  0xd8   : > { %470 = vst [vmem:[%s207_s22] sm:$0xff] %v469_v14  }
  0xd9   : > { %620 = shalt.err (!%p617_p10)
}
  0xda   : > { %s668_s6 = smov 64   ;;  %s669_s25 = smov 4  }
  0xdb   : > { %477 = dma.vmem_to_hbm [thread:$0]  (%p759_p3), %s318_s24, 128, %s320_s29, %s305_s16, %s668_s6, %s668_s6, %s669_s25  }
  0xdc PF: > { %s334_s18 = sand.u32 1, %s651_s12   ;;  %p846_p12 = scmp.ge.s32.totalorder %s663_s15, 2 }
  0xdd   : > { %s335_s23 = scalar_lea.sflag [#allocation4], %s334_s18 }
  0xde   : > { %p488_p13 = pnand %p846_p12, %p725_p6 }
  0xe0   : > { %p489_p0 = pneg %p488_p13 }
  0xe2   : > { %646 = dma.done.wait (%p489_p0), %s335_s23, 128  }
  0xe3   : > { %648 = vsyncadd (%p489_p0), %s335_s23, 4294967168  ;;  %p17_p5 = scmp.ge.s32.totalorder %s743_s26, 4   ;;  %s847_s12 = smov %s655_s13 }
  0xe4   : > { %s848_s13 = smov %s659_s14  ;;  %s849_s14 = smov %s755_s4 }
  0xe5   : > { %s850_s15 = smov %s743_s26  ;;  %19 = sbr.rel (!%p17_p5) target bundleno = 6 (0x6), region = 81 }
  0xea   :  { %341 = vsyncpa [#allocation3], 1 }
  0xeb   :  { %343 = vsyncpa [#allocation3 + $0x1], 1 }
  0xec   :  { %344 = vsyncpa [#allocation6], 1 }
  0xed   :  { %345 = vsyncpa [#allocation4], 1 }
  0xee   :  { %347 = vsyncpa [#allocation4 + $0x1], 1 }

</bundles_post_ra>
